<compile_context>
chip_gen: v7x
topology: tpu7x:2x2x1
jax: 0.10.0
libtpu: 0.0.40
codegen_flags: <defaults>
</compile_context>

<pallas_src>
import functools

import jax
import jax.numpy as jnp
from jax.experimental import pallas as pl
from jax.experimental.pallas import tpu as pltpu

FEATURES = 32
_LANES = 128


def _elu(x):
    # ELU(alpha=1): x if x > 0 else exp(x) - 1.  min() keeps the (discarded)
    # positive branch finite; plain exp is a single EUP op (expm1 may lower to
    # exp plus guard/correction VALU work).
    return jnp.where(x > 0, x, jnp.exp(jnp.minimum(x, 0.0)) - 1.0)


def generator_kernel(mm_dtype, x_ref, wc_ref, w2_ref, w3_ref, b3_ref, o_ref):
    # Transposed layout: x (1, BB), activations (32, BB), output (1, BB).
    x = x_ref[...]                                     # (1, BB) f32

    wc = wc_ref[...]                                   # (32, 128), lane-dense
    w1 = wc[:, 0:1]                                    # (32, 1)
    b1 = wc[:, 1:2]                                    # (32, 1)
    b2 = wc[:, 2:3]                                    # (32, 1)

    # layer1: in_features == 1 -> pure VPU outer-product broadcast (no MXU).
    h1 = _elu(w1 * x + b1)                             # (32, BB)

    # layer2: MXU matmul, bf16 operands (default), f32 accumulation.
    h2 = jnp.dot(w2_ref[...].astype(mm_dtype), h1.astype(mm_dtype),
                 preferred_element_type=jnp.float32)
    h2 = _elu(h2 + b2)                                 # (32, BB)

    # logits: (1,32) @ (32,BB) -> (1,BB); MXU result / store stays B-wide.
    y = jnp.dot(w3_ref[...].astype(mm_dtype), h2.astype(mm_dtype),
                preferred_element_type=jnp.float32)
    o_ref[...] = (y + b3_ref[0, 0]).astype(o_ref.dtype)   # b3 scalar from SMEM


def _choose_blocking(batch, block_b):
    """Round batch to 128-lane chunks and split into near-equal 128-multiple
    blocks; prefer >= 2 grid steps (v7x has 2 TensorCores per chip)."""
    if block_b <= 0 or block_b % _LANES != 0:
        raise ValueError(
            f"block_b must be a positive multiple of {_LANES}, got {block_b}")
    cap_chunks = block_b // _LANES
    total_chunks = pl.cdiv(batch, _LANES)
    n_steps = pl.cdiv(total_chunks, cap_chunks)
    if n_steps == 1 and total_chunks >= 2:
        n_steps = 2                      # let both v7x TensorCores work
    chunks_per_step = pl.cdiv(total_chunks, n_steps)
    bb = chunks_per_step * _LANES
    padded_b = n_steps * bb
    return bb, padded_b, n_steps


def generator_forward(x, params, *, block_b=16384, matmul_dtype=jnp.bfloat16):
    """x: (B, 1) float32 -> (B, 1) float32.

    block_b: batch-block cap in lanes (must be a multiple of 128).  16384
      amortizes the per-grid-step overhead while staying well under VMEM on
      v5e/v6e/v7x; drop to 2048-4096 if a v5e bundle profile shows the single
      vst slot bound by spill stores.
    matmul_dtype: MXU operand dtype (accumulation is always f32).
    """
    w1, b1, w2, b2, w3, b3 = params
    B = x.shape[0]

    bb, padded_b, n_steps = _choose_blocking(B, block_b)

    # (B,1) -> (1,B): contiguous reshape, batch goes onto the lane axis.
    x_row = x.reshape(1, B)
    if padded_b != B:
        x_row = jnp.pad(x_row, ((0, 0), (0, padded_b - B)))

    # Pack the lane-width-1 constants into one lane-dense (32, 128) block:
    # column 0 = w1, column 1 = b1, column 2 = b2.
    wc = jnp.concatenate([w1, b1, b2], axis=1)                  # (32, 3)
    wc = jnp.pad(wc, ((0, 0), (0, _LANES - wc.shape[1])))       # (32, 128)

    n_weight_elems = (2 * FEATURES                      # w1, b1
                      + FEATURES * FEATURES + FEATURES  # w2, b2
                      + FEATURES + 1)                   # w3, b3
    cost = pl.CostEstimate(
        flops=2 * padded_b * (FEATURES + FEATURES * FEATURES + FEATURES),
        transcendentals=2 * FEATURES * padded_b,  # both ELU branches evaluated
        bytes_accessed=4 * (2 * padded_b + n_weight_elems),
    )

    y_row = pl.pallas_call(
        functools.partial(generator_kernel, matmul_dtype),
        out_shape=jax.ShapeDtypeStruct((1, padded_b), jnp.float32),
        grid=(n_steps,),
        in_specs=[
            # x: batch-tiled along lanes.
            pl.BlockSpec((1, bb), lambda i: (0, i)),
            # Packed w1/b1/b2: one lane-dense block, resident across steps.
            pl.BlockSpec((FEATURES, _LANES), lambda i: (0, 0)),
            pl.BlockSpec((FEATURES, FEATURES), lambda i: (0, 0)),   # w2 (32,32)
            pl.BlockSpec((1, FEATURES), lambda i: (0, 0)),          # w3 (1,32)
            # b3: a single scalar -> SMEM, no padded VMEM tile.
            pl.BlockSpec(memory_space=pltpu.MemorySpace.SMEM),      # b3 (1,1)
        ],
        out_specs=pl.BlockSpec((1, bb), lambda i: (0, i)),
        compiler_params=pltpu.CompilerParams(
            dimension_semantics=("parallel",),
            vmem_limit_bytes=32 * 1024 * 1024,
        ),
        cost_estimate=cost,
    )(x_row, wc, w2, w3, b3)

    # Drop batch padding, back to (B, 1).
    return y_row[:, :B].reshape(B, 1)


def init_params(key):
    """Deterministic init; weights kept in PyTorch (out, in) layout.

    w1: (32, 1), b1: (32, 1), w2: (32, 32), b2: (32, 1), w3: (1, 32), b3: (1, 1)
    """
    k1, k2, k3, k4, k5, k6 = jax.random.split(key, 6)
    w1 = jax.random.normal(k1, (FEATURES, 1), jnp.float32) * 0.1
    b1 = jax.random.normal(k2, (FEATURES, 1), jnp.float32) * 0.1
    w2 = jax.random.normal(k3, (FEATURES, FEATURES), jnp.float32) * 0.1
    b2 = jax.random.normal(k4, (FEATURES, 1), jnp.float32) * 0.1
    w3 = jax.random.normal(k5, (1, FEATURES), jnp.float32) * 0.1
    b3 = jax.random.normal(k6, (1, 1), jnp.float32) * 0.1
    return (w1, b1, w2, b2, w3, b3)


def reference_forward(x, params):
    """Pure-JAX reference in the standard (B, F) layout."""
    w1, b1, w2, b2, w3, b3 = params
    h1 = jax.nn.elu(x @ w1.T + b1.reshape(1, FEATURES))
    h2 = jax.nn.elu(h1 @ w2.T + b2.reshape(1, FEATURES))
    return h2 @ w3.T + b3


if __name__ == "__main__":
    key = jax.random.PRNGKey(0)
    kp, kx1, kx2 = jax.random.split(key, 3)
    params = init_params(kp)

    # Small 1-D noise batch (single grid step) and an unaligned batch that
    # exercises padding plus the forced >=2-step ("parallel") multi-block path.
    x_small = jax.random.normal(kx1, (8, 1), jnp.float32)
    x_multi = jax.random.normal(kx2, (300, 1), jnp.float32)

    for x in (x_small, x_multi):
        y_ref = reference_forward(x, params)

        # f32 MXU path: tight check against the pure-JAX reference.
        y_f32 = jax.block_until_ready(
            generator_forward(x, params, matmul_dtype=jnp.float32))
        assert y_f32.shape == x.shape
        assert jnp.allclose(y_f32, y_ref, atol=2e-5, rtol=1e-4)

        # Default bf16-operand MXU path (f32 accumulation): looser tolerance.
        y_bf16 = jax.block_until_ready(generator_forward(x, params))
        assert y_bf16.shape == x.shape
        assert jnp.allclose(y_bf16, y_ref, atol=1e-2, rtol=1e-2)

    print("KERNEL_OK")
</pallas_src>

<mosaic_0001>
module attributes {stable_mosaic.version = 11 : i64} {
  func.func @generator_kernel(%arg0: i32, %arg1: memref<1x128xf32, #tpu.memory_space<vmem>>, %arg2: memref<32x128xf32, #tpu.memory_space<vmem>>, %arg3: memref<32x32xf32, #tpu.memory_space<vmem>>, %arg4: memref<1x32xf32, #tpu.memory_space<vmem>>, %arg5: memref<1x1xf32, #tpu.memory_space<smem>>, %arg6: memref<1x128xf32, #tpu.memory_space<vmem>>) attributes {dimension_semantics = [#tpu.dimension_semantics<parallel>], iteration_bounds = array<i64: 1>, scalar_prefetch = 0 : i64, scratch_operands = 0 : i64, tpu.core_type = #tpu.core_type<tc>, window_params = [{transform_indices = @transform_0, window_bounds = array<i64: 1, 128>}, {pipeline_mode = #tpu.pipeline_mode<synchronous>, transform_indices = @transform_1, window_bounds = array<i64: 32, 128>}, {pipeline_mode = #tpu.pipeline_mode<synchronous>, transform_indices = @transform_2, window_bounds = array<i64: 32, 32>}, {pipeline_mode = #tpu.pipeline_mode<synchronous>, transform_indices = @transform_3, window_bounds = array<i64: 1, 32>}, {transform_indices = @transform_4, window_bounds = array<i64: 1, 1>}, {transform_indices = @transform_5, window_bounds = array<i64: 1, 128>}]} {
    %c0 = arith.constant 0 : index
    %c0_0 = arith.constant 0 : index
    %0 = vector.load %arg1[%c0, %c0_0] : memref<1x128xf32, #tpu.memory_space<vmem>>, vector<1x128xf32>
    %c0_1 = arith.constant 0 : index
    %c0_2 = arith.constant 0 : index
    %1 = vector.load %arg2[%c0_1, %c0_2] : memref<32x128xf32, #tpu.memory_space<vmem>>, vector<32x128xf32>
    %2 = vector.extract_strided_slice %1 {offsets = [0, 0], sizes = [32, 1], strides = [1, 1]} : vector<32x128xf32> to vector<32x1xf32>
    %3 = vector.extract_strided_slice %1 {offsets = [0, 1], sizes = [32, 1], strides = [1, 1]} : vector<32x128xf32> to vector<32x1xf32>
    %4 = vector.extract_strided_slice %1 {offsets = [0, 2], sizes = [32, 1], strides = [1, 1]} : vector<32x128xf32> to vector<32x1xf32>
    %5 = vector.broadcast %2 : vector<32x1xf32> to vector<32x128xf32>
    %6 = vector.broadcast %0 : vector<1x128xf32> to vector<32x128xf32>
    %7 = arith.mulf %5, %6 : vector<32x128xf32>
    %8 = vector.broadcast %3 : vector<32x1xf32> to vector<32x128xf32>
    %9 = arith.addf %7, %8 : vector<32x128xf32>
    %cst = arith.constant 0.000000e+00 : f32
    %10 = vector.broadcast %cst : f32 to vector<32x128xf32>
    %11 = arith.cmpf ogt, %9, %10 : vector<32x128xf32>
    %cst_3 = arith.constant 0.000000e+00 : f32
    %12 = vector.broadcast %cst_3 : f32 to vector<32x128xf32>
    %13 = arith.minimumf %9, %12 : vector<32x128xf32>
    %14 = math.exp %13 : vector<32x128xf32>
    %cst_4 = arith.constant 1.000000e+00 : f32
    %15 = vector.broadcast %cst_4 : f32 to vector<32x128xf32>
    %16 = arith.subf %14, %15 : vector<32x128xf32>
    %17 = arith.select %11, %9, %16 : vector<32x128xi1>, vector<32x128xf32>
    %c0_5 = arith.constant 0 : index
    %c0_6 = arith.constant 0 : index
    %18 = vector.load %arg3[%c0_5, %c0_6] : memref<32x32xf32, #tpu.memory_space<vmem>>, vector<32x32xf32>
    %cst_7 = arith.constant dense<0.000000e+00> : vector<32x128xf32>
    %19 = tpu.matmul %18, %17, %cst_7 {dimension_numbers = #tpu.dot_dimension_numbers<[1], [0], [0], [1], [0, 0, 1, 1], [], []>} : vector<32x32xf32>, vector<32x128xf32>, vector<32x128xf32> -> vector<32x128xf32>
    %20 = vector.broadcast %4 : vector<32x1xf32> to vector<32x128xf32>
    %21 = arith.addf %19, %20 : vector<32x128xf32>
    %cst_8 = arith.constant 0.000000e+00 : f32
    %22 = vector.broadcast %cst_8 : f32 to vector<32x128xf32>
    %23 = arith.cmpf ogt, %21, %22 : vector<32x128xf32>
    %cst_9 = arith.constant 0.000000e+00 : f32
    %24 = vector.broadcast %cst_9 : f32 to vector<32x128xf32>
    %25 = arith.minimumf %21, %24 : vector<32x128xf32>
    %26 = math.exp %25 : vector<32x128xf32>
    %cst_10 = arith.constant 1.000000e+00 : f32
    %27 = vector.broadcast %cst_10 : f32 to vector<32x128xf32>
    %28 = arith.subf %26, %27 : vector<32x128xf32>
    %29 = arith.select %23, %21, %28 : vector<32x128xi1>, vector<32x128xf32>
    %c0_11 = arith.constant 0 : index
    %c0_12 = arith.constant 0 : index
    %30 = vector.load %arg4[%c0_11, %c0_12] : memref<1x32xf32, #tpu.memory_space<vmem>>, vector<1x32xf32>
    %cst_13 = arith.constant dense<0.000000e+00> : vector<1x128xf32>
    %31 = tpu.matmul %30, %29, %cst_13 {dimension_numbers = #tpu.dot_dimension_numbers<[1], [0], [0], [1], [0, 0, 1, 1], [], []>} : vector<1x32xf32>, vector<32x128xf32>, vector<1x128xf32> -> vector<1x128xf32>
    %c0_14 = arith.constant 0 : index
    %c0_15 = arith.constant 0 : index
    %32 = memref.load %arg5[%c0_14, %c0_15] : memref<1x1xf32, #tpu.memory_space<smem>>
    %33 = vector.broadcast %32 : f32 to vector<1x128xf32>
    %34 = arith.addf %31, %33 : vector<1x128xf32>
    %c0_16 = arith.constant 0 : index
    %c0_17 = arith.constant 0 : index
    %35 = vector.load %arg6[%c0_16, %c0_17] : memref<1x128xf32, #tpu.memory_space<vmem>>, vector<1x128xf32>
    tpu.vector_store %arg6[%c0_16, %c0_17], %34 {strides = array<i32>} : memref<1x128xf32, #tpu.memory_space<vmem>>, vector<1x128xf32>,
    return
  }
  func.func @transform_0(%arg0: i32) -> (i32, i32) {
    %c0_i32 = arith.constant 0 : i32
    %c0_i32_0 = arith.constant 0 : i32
    return %c0_i32, %arg0 : i32, i32
  }
  func.func @transform_1(%arg0: i32) -> (i32, i32) {
    %c0_i32 = arith.constant 0 : i32
    %c0_i32_0 = arith.constant 0 : i32
    %c0_i32_1 = arith.constant 0 : i32
    return %c0_i32, %c0_i32_0 : i32, i32
  }
  func.func @transform_2(%arg0: i32) -> (i32, i32) {
    %c0_i32 = arith.constant 0 : i32
    %c0_i32_0 = arith.constant 0 : i32
    %c0_i32_1 = arith.constant 0 : i32
    return %c0_i32, %c0_i32_0 : i32, i32
  }
  func.func @transform_3(%arg0: i32) -> (i32, i32) {
    %c0_i32 = arith.constant 0 : i32
    %c0_i32_0 = arith.constant 0 : i32
    %c0_i32_1 = arith.constant 0 : i32
    return %c0_i32, %c0_i32_0 : i32, i32
  }
  func.func @transform_4(%arg0: i32) -> (i32, i32) {
    %c0_i32 = arith.constant 0 : i32
    %c0_i32_0 = arith.constant 0 : i32
    %c0_i32_1 = arith.constant 0 : i32
    return %c0_i32, %c0_i32_0 : i32, i32
  }
  func.func @transform_5(%arg0: i32) -> (i32, i32) {
    %c0_i32 = arith.constant 0 : i32
    %c0_i32_0 = arith.constant 0 : i32
    return %c0_i32, %arg0 : i32, i32
  }
}

</mosaic_0001>

<bundles_post_ra>
// kernel: tpu_custom_call.1
= control target key start
LH: loop header
LB: loop body
LE: loop exit
PB: predicated region body
PF: predicated region fallthrough
CT: control target
= control target key end

     0   :  { %11 = vsyncpa [#allocation4], 0  ;;  %s627_s0 = inlined_call_operand.vmem [shape: f32[1,128], index: 0, kind: input, shape index: {}]   ;;  %s628_s1 = inlined_call_operand.hbm [shape: f32[32,128], index: 1, kind: input, shape index: {}]   ;;  %s629_s2 = inlined_call_operand.hbm [shape: f32[32,32], index: 2, kind: input, shape index: {}]   ;;  %s630_s3 = inlined_call_operand.vmem [shape: f32[1,32], index: 3, kind: input, shape index: {}]   ;;  %s631_s4 = inlined_call_operand.<no memory space> [shape: f32[1,1], index: 4, kind: input, shape index: {}]   ;;  %s632_s5 = inlined_call_operand.hbm [shape: f32[1,128], index: 5, kind: output, shape index: {}]  }
   0x1   :  { %12 = vsyncpa [#allocation7], 0 }
   0x2   :  { %13 = vsyncpa [#allocation5], 0  ;;  %s536_s18 = smov [#allocation3]   ;;  %s464_s22 = scalar_lea.hbm %s628_s1, 512 }
   0x3   :  { %s21_s19 = sshll.u32 %s536_s18, 4  ;;  %p465_p0 = scmp.ne.s32.totalorder %s628_s1, %s464_s22  ;;  %s22_s19 = int_to_ptr.vmem [resolvable:$true] %s21_s19 }
   0x4   :  { %p468_p1 = scmp.lt.u32.totalorder %s464_s22, %s628_s1 }
   0x6   :  { %p470_p2 = pnand %p468_p1, %p465_p0 }
   0x8   :  { %473 = shalt.err (!%p470_p2)
}
   0x9   :  { %s474_s27 = scalar_lea.vmem %s22_s19, 512  ;;  %p479_p4 = scmp.lt.s32.totalorder %s22_s19, %s22_s19 }
   0xa   :  { %p475_p3 = scmp.ne.s32.totalorder %s22_s19, %s474_s27  ;;  %p480_p5 = scmp.lt.s32.totalorder %s474_s27, %s474_s27 }
   0xc   :  { %p481_p6 = por %p480_p5, %p479_p4 }
   0xe   :  { %p482_p7 = pnand %p481_p6, %p475_p3 }
  0x10   :  { %485 = shalt.err (!%p482_p7)
}
  0x11   :  { %s537_s28 = smov 128   ;;  %s538_s29 = smov 8  }
  0x12   :  { %27 = dma.hbm_to_vmem [thread:$0]  %s628_s1, 512, %s22_s19, [#allocation4], %s537_s28, %s537_s28, %s538_s29  }
  0x13   :  { %s539_s7 = smov [#allocation6]   ;;  %s486_s11 = scalar_lea.hbm %s629_s2, 512 }
  0x14   :  { %s33_s8 = sshll.u32 %s539_s7, 4  ;;  %p487_p8 = scmp.ne.s32.totalorder %s629_s2, %s486_s11  ;;  %s34_s8 = int_to_ptr.vmem [resolvable:$true] %s33_s8 }
  0x15   :  { %p490_p9 = scmp.lt.u32.totalorder %s486_s11, %s629_s2 }
  0x17   :  { %p492_p10 = pnand %p490_p9, %p487_p8 }
  0x19   :  { %495 = shalt.err (!%p492_p10)
}
  0x1a   :  { %s496_s16 = scalar_lea.vmem %s34_s8, 512  ;;  %p501_p12 = scmp.lt.s32.totalorder %s34_s8, %s34_s8 }
  0x1b   :  { %p497_p11 = scmp.ne.s32.totalorder %s34_s8, %s496_s16  ;;  %p502_p13 = scmp.lt.s32.totalorder %s496_s16, %s496_s16 }
  0x1d   :  { %p503_p0 = por %p502_p13, %p501_p12 }
  0x1f   :  { %p504_p1 = pnand %p503_p0, %p497_p11 }
  0x21   :  { %507 = shalt.err (!%p504_p1)
}
  0x22   :  { %39 = dma.hbm_to_vmem [thread:$0]  %s629_s2, 512, %s34_s8, [#allocation7], %s537_s28, %s537_s28, %s538_s29  }
  0x23   :  { %530 = dma.done.wait [#allocation4], 512  }
  0x24   :  { %531 = vsyncadd [#allocation4], 4294966784 }
  0x25   :  { %532 = dma.done.wait [#allocation7], 512  }
  0x26   :  { %533 = vsyncadd [#allocation7], 4294966784  ;;  %v540_v0 = vmov 1   ;;  %v541_v1 = vmov 0   ;;  %v51_v2 = vld [vmem:[#allocation3] sm:$0xff]  ;;  %v52_v3 = vld [vmem:[#allocation3 + $0x8] sm:$0xff] }
  0x27   :  { %442 = vset.pattern.permute.xlu1 %v540_v0  ;;  %441 = vset.pattern.permute.xlu0 %v541_v1  ;;  %v53_v4 = vld [vmem:[#allocation3 + $0x10] sm:$0xff]  ;;  %v54_v5 = vld [vmem:[#allocation3 + $0x18] sm:$0xff]  ;;  %v129_v6 = vld [vmem:[#allocation6] sm:$0xff]  ;;  %vm149_vm0 = vcmask 261120   ;;  %v542_v7 = vmov 2   ;;  %v543_v50 = vmov 0.0|0.0  }
  0x28   :  { %86 = vperm.xlu1 %442, %v51_v2   ;;  %57 = vperm.xlu0 %441, %v51_v2   ;;  %v364_v8 = vld [vmem:[%s627_s0] ss:$0 sm:$0xff]  ;;  %v130_v47 = vld [vmem:[#allocation6 + $0x8] sm:$0xff]  ;;  %v131_v48 = vld [vmem:[#allocation6 + $0x10] sm:$0xff]  ;;  %vm544_vm5 = vmmov 0   ;;  %v545_v51 = vmov 0.0  }
  0x29   :  { %399 = vmatprep.mubr.msk.f32.mxu0 %vm149_vm0, %v129_v6  ;;  %v132_v49 = vld [vmem:[#allocation6 + $0x18] sm:$0xff]  ;;  %424 = vmatprep.subr.bf16.mxu1 %v543_v50  ;;  %s546_s22 = smov [#allocation8]  }
  0x2a   :  { %413 = vmatprep.mubr.msk.f32.mxu1 %vm544_vm5, %v545_v51  ;;  %s354_s23 = sshll.u32 %s546_s22, 4  ;;  %s355_s23 = int_to_ptr.vmem [resolvable:$true] %s354_s23 }
  0x2b   :  { %s508_s24 = scalar_lea.vmem %s355_s23, 16  ;;  %s512_s25 = scalar_lea.vmem %s355_s23, 32 }
  0x2c   :  { %90 = vperm.xlu1 %442, %v52_v3   ;;  %62 = vperm.xlu0 %441, %v52_v3   ;;  %p509_p2 = scmp.ne.s32.totalorder %s355_s23, %s508_s24  ;;  %p513_p3 = scmp.lt.s32.totalorder %s355_s23, %s355_s23 }
  0x2d   :  { %p514_p4 = scmp.lt.s32.totalorder %s512_s25, %s508_s24 }
  0x2f   :  { %p515_p5 = por %p514_p4, %p513_p3 }
  0x30   :  { %443 = vset.pattern.permute.xlu1 %v541_v1  ;;  %67 = vperm.xlu0 %441, %v53_v4  }
  0x31   :  { %72 = vperm.xlu1 %443, %v54_v5   ;;  %p516_p6 = pnand %p515_p5, %p509_p2 }
  0x34   :  { %444 = vset.pattern.permute.xlu0 %v540_v0 }
  0x35   :  { %445 = vset.pattern.permute.xlu1 %v540_v0  ;;  %94 = vperm.xlu0 %444, %v53_v4  }
  0x36   :  { %98 = vperm.xlu1 %445, %v54_v5  }
  0x39   :  { %447 = vset.pattern.permute.xlu0 %v542_v7 }
  0x3a   :  { %446 = vset.pattern.permute.xlu1 %v542_v7  ;;  %138 = vperm.xlu0 %447, %v52_v3  }
  0x3b   :  { %134 = vperm.xlu1 %446, %v51_v2  }
  0x3f   :  { %142 = vperm.xlu1 %446, %v53_v4  }
  0x43   :  { %146 = vperm.xlu1 %446, %v54_v5  }
  0xa7   :  { %v87_v9 = vpop.permute.xlu1 %86  ;;  %v58_v10 = vpop.permute.xlu0 %57 }
  0xa8   :  { %v81_v11 = vmul.f32 %v364_v8, %v58_v10 }
  0xaa   :  { %v101_v12 = vadd.f32 %v87_v9, %v81_v11 }
  0xab   :  { %v91_v13 = vpop.permute.xlu1 %90  ;;  %v63_v14 = vpop.permute.xlu0 %62 }
  0xac   :  { %v109_v15 = vmin.f32 %v101_v12, 0.0  ;;  %v82_v16 = vmul.f32 %v364_v8, %v63_v14  ;;  %vm105_vm1 = vcmp.gt.f32.partialorder %v101_v12, 0.0 }
  0xae   :  { %v113_v17 = vmul.f32 1.442695, %v109_v15  ;;  %v102_v18 = vadd.f32 %v91_v13, %v82_v16 }
  0xaf   :  { %v68_v19 = vpop.permute.xlu0 %67 }
  0xb0   :  { %448 = vpow2.f32 %v113_v17  ;;  %v110_v20 = vmin.f32 %v102_v18, 0.0  ;;  %v73_v21 = vpop.permute.xlu1 %72  ;;  %v83_v23 = vmul.f32 %v364_v8, %v68_v19  ;;  %vm106_vm2 = vcmp.gt.f32.partialorder %v102_v18, 0.0 }
  0xb1   :  { %v84_v24 = vmul.f32 %v364_v8, %v73_v21 }
  0xb2   :  { %v115_v22 = vmul.f32 1.442695, %v110_v20 }
  0xb4   :  { %450 = vpow2.f32 %v115_v22  ;;  %v95_v25 = vpop.permute.xlu0 %94  ;;  %v271_v22 = vld [vmem:[%s630_s3] sm:$0x1] }
  0xb5   :  { %v103_v26 = vadd.f32 %v95_v25, %v83_v23  ;;  %v99_v27 = vpop.permute.xlu1 %98  ;;  %v273_v23 = vstv %s631_s4 }
  0xb6   :  { %v104_v28 = vadd.f32 %v99_v27, %v84_v24 }
  0xb7   :  { %v111_v29 = vmin.f32 %v103_v26, 0.0  ;;  %vm107_vm3 = vcmp.gt.f32.partialorder %v103_v26, 0.0 }
  0xb8   :  { %v112_v30 = vmin.f32 %v104_v28, 0.0  ;;  %vm108_vm4 = vcmp.gt.f32.partialorder %v104_v28, 0.0 }
  0xb9   :  { %v117_v31 = vmul.f32 1.442695, %v111_v29  ;;  %v139_v54 = vpop.permute.xlu0 %138 }
  0xba   :  { %v449_v32 = vpop.eup %448  ;;  %v119_v33 = vmul.f32 1.442695, %v112_v30  ;;  %v135_v52 = vpop.permute.xlu1 %134 }
  0xbb   :  { %452 = vpow2.f32 %v117_v31  ;;  %v365_v34 = vadd.f32 -1.0, %v449_v32 }
  0xbc   :  { %454 = vpow2.f32 %v119_v33 }
  0xbd   :  { %v125_v37 = vsel %vm105_vm1, %v101_v12, %v365_v34 }
  0xbe   :  { %v451_v35 = vpop.eup %450  ;;  %v143_v53 = vpop.permute.xlu1 %142 }
  0xbf   :  { %v366_v36 = vadd.f32 -1.0, %v451_v35 }
  0xc1   :  { %v126_v38 = vsel %vm106_vm2, %v102_v18, %v366_v36 }
  0xc2   :  { %v416_v39 = vpack.c.bf16 %v126_v38, %v125_v37  ;;  %v147_v60 = vpop.permute.xlu1 %146 }
  0xc4   :  { %417 = vmatprep.subr.bf16.mxu0 %v416_v39 }
  0xc5   :  { %v453_v40 = vpop.eup %452  ;;  %419 = vmatpush3.bf16.msra.mxu0 %v416_v39 }
  0xc6   :  { %v455_v41 = vpop.eup %454  ;;  %v367_v42 = vadd.f32 -1.0, %v453_v40 }
  0xc7   :  { %v368_v43 = vadd.f32 -1.0, %v455_v41 }
  0xc8   :  { %v127_v44 = vsel %vm107_vm3, %v103_v26, %v367_v42 }
  0xc9   :  { %v128_v45 = vsel %vm108_vm4, %v104_v28, %v368_v43 }
  0xca   :  { %v420_v46 = vpack.c.bf16 %v128_v45, %v127_v44 }
  0xcc   :  { %421 = vmatprep.subr.bf16.mxu0 %v420_v46 }
  0xcd   :  { %423 = vmatpush3.bf16.msra.mxu0 %v420_v46 }
  0xd0   :  { %400 = vmatmul.mubr.msk.f32.vlgmr.msra.gmra.mrb[0].mxu0 %vm149_vm0, %v130_v47 }
  0xd1   :  { %402 = vmatprep.mubr.msk.f32.mxu0 %vm149_vm0, %v131_v48 }
  0xd4   :  { %403 = vmatmul.mubr.msk.f32.gmra.mrb[2].mxu0 %vm149_vm0, %v132_v49 }
 0x1a3   :  { %v401_v55 = vpop.f32.mrb[0].mxu0 }
 0x1a4   :  { %v234_v56 = vadd.f32 %v401_v55, %v139_v54  ;;  %v228_v57 = vpop.f32.mrb[1].mxu0 }
 0x1a5   :  { %v229_v58 = vadd.f32 %v228_v57, %v135_v52 }
 0x1a6   :  { %v252_v59 = vmin.f32 %v234_v56, 0.0  ;;  %vm248_vm6 = vcmp.gt.f32.partialorder %v234_v56, 0.0 }
 0x1a7   :  { %v251_v61 = vmin.f32 %v229_v58, 0.0  ;;  %v404_v62 = vpop.f32.mrb[2].mxu0  ;;  %vm247_vm7 = vcmp.gt.f32.partialorder %v229_v58, 0.0 }
 0x1a8   :  { %v257_v63 = vmul.f32 1.442695, %v252_v59  ;;  %v244_v0 = vadd.f32 %v404_v62, %v147_v60  ;;  %v238_v1 = vpop.f32.mrb[3].mxu0 }
 0x1a9   :  { %v255_v2 = vmul.f32 1.442695, %v251_v61  ;;  %v239_v3 = vadd.f32 %v238_v1, %v143_v53 }
 0x1aa   :  { %456 = vpow2.f32 %v257_v63  ;;  %v254_v4 = vmin.f32 %v244_v0, 0.0  ;;  %vm250_vm8 = vcmp.gt.f32.partialorder %v244_v0, 0.0 }
 0x1ab   :  { %458 = vpow2.f32 %v255_v2  ;;  %v253_v5 = vmin.f32 %v239_v3, 0.0  ;;  %vm249_vm9 = vcmp.gt.f32.partialorder %v239_v3, 0.0 }
 0x1ac   :  { %v261_v6 = vmul.f32 1.442695, %v254_v4 }
 0x1ad   :  { %v259_v7 = vmul.f32 1.442695, %v253_v5 }
 0x1ae   :  { %460 = vpow2.f32 %v261_v6 }
 0x1af   :  { %462 = vpow2.f32 %v259_v7 }
 0x1b4   :  { %v457_v8 = vpop.eup %456 }
 0x1b5   :  { %v459_v9 = vpop.eup %458  ;;  %v374_v10 = vadd.f32 -1.0, %v457_v8 }
 0x1b6   :  { %v373_v11 = vadd.f32 -1.0, %v459_v9 }
 0x1b7   :  { %v268_v12 = vsel %vm248_vm6, %v234_v56, %v374_v10 }
 0x1b8   :  { %v461_v13 = vpop.eup %460  ;;  %v267_v14 = vsel %vm247_vm7, %v229_v58, %v373_v11 }
 0x1b9   :  { %v463_v15 = vpop.eup %462  ;;  %v376_v16 = vadd.f32 -1.0, %v461_v13  ;;  %v425_v17 = vpack.c.bf16 %v268_v12, %v267_v14 }
 0x1ba   :  { %v375_v18 = vadd.f32 -1.0, %v463_v15 }
 0x1bb   :  { %426 = vmatpush3.bf16.msra.mxu1 %v425_v17  ;;  %v270_v19 = vsel %vm250_vm8, %v244_v0, %v376_v16 }
 0x1bc   :  { %427 = vmatprep.subr.bf16.mxu1 %v543_v50  ;;  %v269_v20 = vsel %vm249_vm9, %v239_v3, %v375_v18 }
 0x1bd   :  { %v428_v21 = vpack.c.bf16 %v270_v19, %v269_v20 }
 0x1bf   :  { %429 = vmatpush3.bf16.msra.mxu1 %v428_v21 }
 0x1c2   :  { %414 = vmatmul.mubr.msk.f32.vlgmr.msra.gmra.mrb[0].mxu1 %vm149_vm0, %v271_v22 }
 0x295   :  { %v343_v24 = vpop.f32.mrb[0].mxu1 }
 0x296   :  { %v344_v25 = vadd.f32 %v343_v24, %v273_v23  ;;  %v415_v26 = vpop.f32.mrb[1].mxu1 }
 0x298   :  { %347 = vst [vmem:[#allocation8] sm:$0x1] %v344_v25 }
 0x299   :  { %519 = shalt.err (!%p516_p6)
}
 0x29a   :  { %s520_s27 = scalar_lea.hbm %s632_s5, 16 }
 0x29b   :  { %p521_p7 = scmp.ne.s32.totalorder %s632_s5, %s520_s27  ;;  %p524_p8 = scmp.lt.u32.totalorder %s520_s27, %s632_s5 }
 0x29d   :  { %p526_p9 = pnand %p524_p8, %p521_p7 }
 0x29f   :  { %529 = shalt.err (!%p526_p9)
}
 0x2a0   :  { %357 = dma.vmem_to_hbm [thread:$0]  %s355_s23, 16, %s632_s5, [#allocation5]  }
 0x2a1   :  { %534 = dma.done.wait [#allocation5], 16  }
 0x2a2   :  { %535 = vsyncadd [#allocation5], 4294967280 }
 0x2a3   :  { %361 = vsyncpa [#allocation4], 1 }
 0x2a4   :  { %362 = vsyncpa [#allocation7], 1 }
 0x2a5   :  { %363 = vsyncpa [#allocation5], 1 }

</bundles_post_ra>
